<compile_context>
chip_gen: v6e
topology: v6e:2x2x1
jax: 0.10.0
libtpu: 0.0.40
codegen_flags: <defaults>
</compile_context>

<pallas_src>
import jax
import jax.numpy as jnp
from jax.experimental import pallas as pl
from jax.experimental.pallas import tpu as pltpu


def _round_up(n, m):
    return (n + m - 1) // m * m


def concat_squash_kernel(x_ref, w_ref, gate_ref, fbias_ref, o_ref):
    # MXU: (tb, Din_p) @ (Din_p, Dout_p), f32 accumulate.
    lin = jnp.dot(x_ref[...], w_ref[...], preferred_element_type=jnp.float32)
    # VPU: broadcast (1, Dout_p) gate / fused-bias rows over the batch tile.
    o_ref[...] = (lin * gate_ref[...] + fbias_ref[...]).astype(o_ref.dtype)


def concat_squash_linear(t, x, W, b, Wg, bg, Wb, *, tb=None, compute_dtype=None):
    """ConcatSquashLinear forward.

    t: scalar time; x: (B, D_in);
    W: (D_out, D_in), b: (D_out,)        -- _layer
    Wg: (D_out, 1),  bg: (D_out,)        -- _hyper_gate
    Wb: (D_out, 1)                       -- _hyper_bias (no bias)
    compute_dtype: e.g. jnp.bfloat16 to run the matmul operands in bf16
                   (f32 accumulation); None keeps x's dtype.
    """
    B, D_in = x.shape
    D_out = W.shape[0]
    out_dtype = x.dtype
    cdt = jnp.dtype(compute_dtype) if compute_dtype is not None else jnp.dtype(x.dtype)

    # ---- lane-dense padding of the feature dims ----------------------------
    D_in_p = _round_up(D_in, 128)
    D_out_p = _round_up(D_out, 128)

    # ---- batch tile selection ----------------------------------------------
    if tb is None:
        b8 = _round_up(B, 8)
        if b8 >= 1024:
            tb = 512
        elif b8 >= 512:
            tb = 256                       # multiple of 128, >=2 grid steps
        elif b8 > 8:
            tb = max(8, _round_up((b8 + 1) // 2, 8))  # >=2 steps for v7x's 2 TCs
        else:
            tb = b8
    B_p = _round_up(B, tb)

    # ---- t-only gate / fused bias, computed once in the wrapper ------------
    t_f = jnp.asarray(t, jnp.float32).reshape(())
    wg_row = Wg.reshape(1, D_out).astype(jnp.float32)
    bg_row = bg.reshape(1, D_out).astype(jnp.float32)
    wb_row = Wb.reshape(1, D_out).astype(jnp.float32)
    b_row = b.reshape(1, D_out).astype(jnp.float32)

    gate = jax.nn.sigmoid(t_f * wg_row + bg_row)          # (1, D_out) f32
    fbias = b_row * gate + t_f * wb_row                   # b*gate + t*Wb

    gate_p = jnp.pad(gate, ((0, 0), (0, D_out_p - D_out)))
    fbias_p = jnp.pad(fbias, ((0, 0), (0, D_out_p - D_out)))

    # ---- padded, lane-dense matmul operands --------------------------------
    x_p = jnp.pad(x.astype(cdt), ((0, B_p - B), (0, D_in_p - D_in)))
    w_p = jnp.pad(W.T.astype(cdt), ((0, D_in_p - D_in), (0, D_out_p - D_out)))

    # ---- explicit scoped-VMEM budget (double-buffered x/out + resident W) --
    in_sz = jnp.dtype(cdt).itemsize
    out_sz = jnp.dtype(out_dtype).itemsize
    vmem_est = (2 * tb * D_in_p * in_sz          # double-buffered x tiles
                + 2 * tb * D_out_p * out_sz      # double-buffered out tiles
                + D_in_p * D_out_p * in_sz       # resident W
                + 4 * D_out_p * 4)               # gate + fbias rows
    vmem_limit = int(max(32 * 1024 * 1024, min(2 * vmem_est, 96 * 1024 * 1024)))

    out_p = pl.pallas_call(
        concat_squash_kernel,
        out_shape=jax.ShapeDtypeStruct((B_p, D_out_p), out_dtype),
        grid_spec=pltpu.PrefetchScalarGridSpec(
            num_scalar_prefetch=0,
            grid=(B_p // tb,),
            in_specs=[
                pl.BlockSpec((tb, D_in_p), lambda i: (i, 0)),        # x tile
                pl.BlockSpec((D_in_p, D_out_p), lambda i: (0, 0)),   # W^T (resident)
                pl.BlockSpec((1, D_out_p), lambda i: (0, 0)),        # gate row
                pl.BlockSpec((1, D_out_p), lambda i: (0, 0)),        # fused-bias row
            ],
            out_specs=pl.BlockSpec((tb, D_out_p), lambda i: (i, 0)),
        ),
        compiler_params=pltpu.CompilerParams(
            dimension_semantics=("parallel",),
            vmem_limit_bytes=vmem_limit,
        ),
    )(x_p, w_p, gate_p, fbias_p)

    return out_p[:B, :D_out]


if __name__ == "__main__":
    key = jax.random.PRNGKey(0)
    B, D_in, D_out = 16, 32, 64
    k = jax.random.split(key, 6)

    # Deterministic parameter init (PyTorch-Linear-style uniform bounds).
    bound = 1.0 / (D_in ** 0.5)
    W = jax.random.uniform(k[0], (D_out, D_in), jnp.float32, -bound, bound)   # _layer.weight
    b = jax.random.uniform(k[1], (D_out,), jnp.float32, -bound, bound)        # _layer.bias
    Wg = jax.random.uniform(k[2], (D_out, 1), jnp.float32, -1.0, 1.0)         # _hyper_gate.weight
    bg = jax.random.uniform(k[3], (D_out,), jnp.float32, -1.0, 1.0)           # _hyper_gate.bias
    Wb = jax.random.uniform(k[4], (D_out, 1), jnp.float32, -1.0, 1.0)         # _hyper_bias.weight

    x = jax.random.normal(k[5], (B, D_in), jnp.float32)
    t = jnp.float32(0.37)

    # Pure-JAX reference of the PyTorch forward.
    lin = x @ W.T + b                                  # self._layer(x)
    gate_ref = jax.nn.sigmoid(t * Wg.T + bg)           # sigmoid(self._hyper_gate(t))
    hb_ref = t * Wb.T                                  # self._hyper_bias(t)
    ref = lin * gate_ref + hb_ref

    # f32 path (tight tolerance).
    out = jax.block_until_ready(concat_squash_linear(t, x, W, b, Wg, bg, Wb))
    assert out.shape == (B, D_out)
    assert jnp.allclose(out, ref, atol=1e-5, rtol=1e-5), float(jnp.max(jnp.abs(out - ref)))

    # bf16 matmul-operand path (f32 accumulation), loose tolerance.
    out_bf = jax.block_until_ready(
        concat_squash_linear(t, x, W, b, Wg, bg, Wb, compute_dtype=jnp.bfloat16))
    assert out_bf.shape == (B, D_out)
    assert jnp.allclose(out_bf, ref, atol=1e-1, rtol=1e-1), float(jnp.max(jnp.abs(out_bf - ref)))

    print("KERNEL_OK")
</pallas_src>

<mosaic_0001>
module attributes {stable_mosaic.version = 11 : i64} {
  func.func @concat_squash_kernel(%arg0: i32, %arg1: memref<8x128xf32, #tpu.memory_space<vmem>>, %arg2: memref<128x128xf32, #tpu.memory_space<vmem>>, %arg3: memref<1x128xf32, #tpu.memory_space<vmem>>, %arg4: memref<1x128xf32, #tpu.memory_space<vmem>>, %arg5: memref<8x128xf32, #tpu.memory_space<vmem>>) attributes {dimension_semantics = [#tpu.dimension_semantics<parallel>], iteration_bounds = array<i64: 2>, scalar_prefetch = 0 : i64, scratch_operands = 0 : i64, tpu.core_type = #tpu.core_type<tc>, window_params = [{transform_indices = @transform_0, window_bounds = array<i64: 8, 128>}, {pipeline_mode = #tpu.pipeline_mode<synchronous>, transform_indices = @transform_1, window_bounds = array<i64: 128, 128>}, {pipeline_mode = #tpu.pipeline_mode<synchronous>, transform_indices = @transform_2, window_bounds = array<i64: 1, 128>}, {pipeline_mode = #tpu.pipeline_mode<synchronous>, transform_indices = @transform_3, window_bounds = array<i64: 1, 128>}, {transform_indices = @transform_4, window_bounds = array<i64: 8, 128>}]} {
    %c0 = arith.constant 0 : index
    %c0_0 = arith.constant 0 : index
    %0 = vector.load %arg1[%c0, %c0_0] : memref<8x128xf32, #tpu.memory_space<vmem>>, vector<8x128xf32>
    %c0_1 = arith.constant 0 : index
    %c0_2 = arith.constant 0 : index
    %1 = vector.load %arg2[%c0_1, %c0_2] : memref<128x128xf32, #tpu.memory_space<vmem>>, vector<128x128xf32>
    %cst = arith.constant dense<0.000000e+00> : vector<8x128xf32>
    %2 = tpu.matmul %0, %1, %cst {dimension_numbers = #tpu.dot_dimension_numbers<[1], [0], [0], [1], [0, 0, 1, 1], [], []>} : vector<8x128xf32>, vector<128x128xf32>, vector<8x128xf32> -> vector<8x128xf32>
    %c0_3 = arith.constant 0 : index
    %c0_4 = arith.constant 0 : index
    %3 = vector.load %arg3[%c0_3, %c0_4] : memref<1x128xf32, #tpu.memory_space<vmem>>, vector<1x128xf32>
    %4 = vector.broadcast %3 : vector<1x128xf32> to vector<8x128xf32>
    %5 = arith.mulf %2, %4 : vector<8x128xf32>
    %c0_5 = arith.constant 0 : index
    %c0_6 = arith.constant 0 : index
    %6 = vector.load %arg4[%c0_5, %c0_6] : memref<1x128xf32, #tpu.memory_space<vmem>>, vector<1x128xf32>
    %7 = vector.broadcast %6 : vector<1x128xf32> to vector<8x128xf32>
    %8 = arith.addf %5, %7 : vector<8x128xf32>
    %c0_7 = arith.constant 0 : index
    %c0_8 = arith.constant 0 : index
    %9 = vector.load %arg5[%c0_7, %c0_8] : memref<8x128xf32, #tpu.memory_space<vmem>>, vector<8x128xf32>
    tpu.vector_store %arg5[%c0_7, %c0_8], %8 {strides = array<i32>} : memref<8x128xf32, #tpu.memory_space<vmem>>, vector<8x128xf32>,
    return
  }
  func.func @transform_0(%arg0: i32) -> (i32, i32) {
    %c0_i32 = arith.constant 0 : i32
    %c0_i32_0 = arith.constant 0 : i32
    return %arg0, %c0_i32 : i32, i32
  }
  func.func @transform_1(%arg0: i32) -> (i32, i32) {
    %c0_i32 = arith.constant 0 : i32
    %c0_i32_0 = arith.constant 0 : i32
    %c0_i32_1 = arith.constant 0 : i32
    return %c0_i32, %c0_i32_0 : i32, i32
  }
  func.func @transform_2(%arg0: i32) -> (i32, i32) {
    %c0_i32 = arith.constant 0 : i32
    %c0_i32_0 = arith.constant 0 : i32
    %c0_i32_1 = arith.constant 0 : i32
    return %c0_i32, %c0_i32_0 : i32, i32
  }
  func.func @transform_3(%arg0: i32) -> (i32, i32) {
    %c0_i32 = arith.constant 0 : i32
    %c0_i32_0 = arith.constant 0 : i32
    %c0_i32_1 = arith.constant 0 : i32
    return %c0_i32, %c0_i32_0 : i32, i32
  }
  func.func @transform_4(%arg0: i32) -> (i32, i32) {
    %c0_i32 = arith.constant 0 : i32
    %c0_i32_0 = arith.constant 0 : i32
    return %arg0, %c0_i32 : i32, i32
  }
}

</mosaic_0001>

<bundles_post_ra>
// kernel: tpu_custom_call.1
= control target key start
LH: loop header
LB: loop body
LE: loop exit
PB: predicated region body
PF: predicated region fallthrough
CT: control target
= control target key end

     0   :  { %9 = vsyncpa [#allocation3], 0  ;;  %s878_s0 = inlined_call_operand.hbm [shape: f32[16,128], index: 0, kind: input, shape index: {}]   ;;  %s879_s1 = inlined_call_operand.hbm [shape: f32[128,128], index: 1, kind: input, shape index: {}]   ;;  %s880_s2 = inlined_call_operand.vmem [shape: f32[1,128], index: 2, kind: input, shape index: {}]   ;;  %s881_s3 = inlined_call_operand.vmem [shape: f32[1,128], index: 3, kind: input, shape index: {}]   ;;  %s882_s4 = inlined_call_operand.hbm [shape: f32[16,128], index: 4, kind: output, shape index: {}]  }
   0x1   :  { %11 = vsyncpa [#allocation3 + $0x1], 0 }
   0x2   :  { %12 = vsyncpa [#allocation6], 0 }
   0x3   :  { %13 = vsyncpa [#allocation4], 0 }
   0x4   :  { %15 = vsyncpa [#allocation4 + $0x1], 0  ;;  %s711_s15 = smov 0   ;;  %s713_s16 = smov 0  }
   0x5   :  { %s715_s17 = smov 0   ;;  %s717_s18 = smov 0  }
   0x6 LB: > { %s732_s19 = sadd.s32 4294967295, %s677_s18   ;;  %s426_s20 = sadd.s32 4294967294, %s677_s18   ;;  %s677_s18 = sphi %s717_s18, %s904_s18   ;;  %s673_s17 = sphi %s715_s17, %s903_s17   ;;  %s669_s16 = sphi %s713_s16, %s902_s16   ;;  %s665_s15 = sphi %s711_s15, %s901_s15  }
   0x7   : > { %p41_p0 = scmp.ne.s32.totalorder %s669_s16, %s665_s15  ;;  %p883_p1 = scmp.eq.s32.totalorder %s732_s19, 0 }
   0x8   : > { %p134_p3 = scmp.eq.s32.totalorder %s426_s20, 1  ;;  %p427_p5 = scmp.ge.s32.totalorder %s677_s18, 1 }
   0x9   : > { %p741_p4 = por %p883_p1, %p41_p0  ;;  %p141_p7 = scmp.lt.s32.totalorder %s677_s18, 3 }
   0xa   : > { %p746_p6 = por %p134_p3, %p41_p0  ;;  %s679_s24 = smov [#allocation5]  }
   0xb   : > { %s887_s21 = scalar_select %p741_p4, 1, 0 }
   0xc   : > { %s888_s22 = scalar_select %p746_p6, 1, 0 }
   0xd   : > { %p751_p8 = pnand %p427_p5, %p141_p7  ;;  %s153_s25 = sshll.u32 %s679_s24, 4  ;;  %s154_s25 = int_to_ptr.vmem [resolvable:$true] %s153_s25 }
   0xe   : > { %s765_s27 = sadd.s32 1, %s677_s18   ;;  %s28_s28 = sadd.s32 1, %s673_s17 }
   0xf   : > { %s889_s23 = scalar_select %p751_p8, 1, 0 }
  0x10   : > { %p502_p9 = pneg %p751_p8  ;;  %s25_s29 = ssub.s32 %s677_s18, %s765_s27 }
  0x11   : > { %s566_s30 = scalar_lea.vmem %s154_s25, 2048  ;;  %p574_p5 = scmp.lt.s32.totalorder %s154_s25, %s154_s25 }
  0x12   : > { %p760_p11 = pnand %p502_p9, %p883_p1  ;;  %p567_p13 = scmp.ne.s32.totalorder %s154_s25, %s566_s30 }
  0x13   : > { %p575_p7 = scmp.lt.s32.totalorder %s566_s30, %s566_s30 }
  0x14   : > { %p557_p12 = pneg %p760_p11 }
  0x15   : > { %p576_p10 = por %p575_p7, %p574_p5 }
  0x16   : > { %p569_p0 = pnand %p567_p13, %p557_p12 }
  0x18   : > { %p570_p3 = pneg %p569_p0 }
  0x1a   : > { %p577_p2 = pnand %p576_p10, %p570_p3 }
  0x1c   : > { %580 = shalt.err (!%p577_p2)
}
  0x1d   : > { %s680_s5 = smov 128   ;;  %s681_s6 = smov 8  }
  0x1e   : > { %505 = dma.hbm_to_vmem [thread:$0]  (!%p760_p11), %s879_s1, 2048, %s154_s25, [#allocation6], %s680_s5, %s680_s5, %s681_s6  }
  0x1f   : > { %p26_p9 = scmp.eq.s32.totalorder %s25_s29, 0  ;;  %p35_p12 = scmp.ne.s32.totalorder %s673_s17, %s669_s16 }
  0x20   : > { %p36_p10 = scmp.eq.s32.totalorder %s677_s18, 0  ;;  %p515_p2 = scmp.lt.s32.totalorder %s677_s18, 2 }
  0x21   : > { %s782_s9 = scalar_select %p26_p9, %s673_s17, %s28_s28  }
  0x22   : > { %p37_p13 = por %p36_p10, %p35_p12  ;;  %p891_p0 = scmp.eq.s32.totalorder %s732_s19, 1 }
  0x23   : > { %s173_s11 = sand.u32 1, %s673_s17   ;;  %s431_s12 = sshll.u32 %s677_s18, 7 }
  0x24   : > { %p786_p3 = por %p891_p0, %p35_p12  ;;  %s430_s13 = sshll.u32 %s173_s11, 3 }
  0x25   : > { %s795_s24 = scalar_lea.hbm %s878_s0, %s431_s12  ;;  %s177_s25 = scalar_lea.vmem [#allocation2], %s430_s13 }
  0x26   : > { %s892_s10 = scalar_select %p786_p3, 1, 0 }
  0x27   : > { %s184_s26 = sshll.u32 %s177_s25, 4  ;;  %p797_p11 = pnand %p515_p2, %p37_p13  ;;  %s185_s26 = int_to_ptr.vmem [resolvable:$true] %s184_s26 }
  0x28   : > { %s174_s29 = scalar_lea.sflag [#allocation3], %s173_s11  ;;  %s581_s30 = scalar_lea.hbm %s795_s24, 128 }
  0x29   : > { %p582_p5 = scmp.ne.s32.totalorder %s795_s24, %s581_s30  ;;  %p583_p7 = pneg %p797_p11 }
  0x2a   : > { %s586_s7 = scalar_lea.hbm %s878_s0, 256  ;;  %p587_p10 = scmp.lt.s32.totalorder %s795_s24, %s878_s0 }
  0x2b   : > { %p584_p9 = pnand %p583_p7, %p582_p5  ;;  %p588_p2 = scmp.lt.s32.totalorder %s586_s7, %s581_s30 }
  0x2d   : > { %p585_p12 = pneg %p584_p9  ;;  %p589_p13 = por %p588_p2, %p587_p10 }
  0x2f   : > { %p590_p0 = pnand %p589_p13, %p585_p12 }
  0x31   : > { %593 = shalt.err (!%p590_p0)
}
  0x32   : > { %s594_s13 = scalar_lea.vmem %s185_s26, 128  ;;  %s682_s11 = smov [#allocation2]  }
  0x33   : > { %p595_p1 = scmp.ne.s32.totalorder %s185_s26, %s594_s13  ;;  %s599_s14 = sshll.u32 %s682_s11, 4  ;;  %s600_s14 = int_to_ptr.vmem [resolvable:$false] %s599_s14 }
  0x34   : > { %s601_s20 = scalar_lea.vmem %s600_s14, 256  ;;  %p602_p5 = scmp.lt.s32.totalorder %s185_s26, %s600_s14 }
  0x35   : > { %p597_p6 = pnand %p595_p1, %p583_p7  ;;  %p603_p9 = scmp.lt.s32.totalorder %s601_s20, %s594_s13 }
  0x37   : > { %p598_p3 = pneg %p597_p6  ;;  %p604_p4 = por %p603_p9, %p602_p5 }
  0x39   : > { %p605_p8 = pnand %p604_p4, %p598_p3 }
  0x3b   : > { %608 = shalt.err (!%p605_p8)
}
  0x3c   : > { %509 = dma.hbm_to_vmem [thread:$0]  (!%p797_p11), %s795_s24, 128, %s185_s26, %s174_s29  }
  0x3d   : > { %p894_p12 = scmp.ne.s32.totalorder %s889_s23, 0 }
  0x3e   : > { %s818_s25 = sand.u32 (!%p894_p12), 1, %s669_s16   ;;  %p895_p1 = scmp.ne.s32.totalorder (!%p894_p12), %s887_s21, 0 }
  0x3f   : > { %193 = sbr.rel (%p894_p12) target bundleno = 315 (0x13b), region = 36  ;;  %s433_s30 = sshll.u32 (!%p894_p12), %s818_s25, 3 }
  0x40   : > { %s196_s5 = scalar_lea.sflag (!%p894_p12), [#allocation3], %s818_s25  ;;  %s824_s6 = scalar_lea.vmem (!%p894_p12), [#allocation2], %s433_s30 }
  0x44   : > { %652 = dma.done.wait (%p895_p1), %s196_s5, 128  }
  0x45   : > { %654 = vsyncadd (%p895_p1), %s196_s5, 4294967168  ;;  %p896_p4 = scmp.eq.s32.totalorder %s732_s19, 0 }
  0x47   : > { %656 = dma.done.wait (%p896_p4), [#allocation6], 2048   ;;  %p897_p6 = pmov %p896_p4 }
  0x48   : > { %v683_v0 = vmov 0.0   ;;  %vm684_vm0 = vmmov 0   ;;  %v244_v1 = vld [vmem:[#allocation5 + $0x78] sm:$0xff]  ;;  %v243_v2 = vld [vmem:[#allocation5 + $0x70] sm:$0xff]  ;;  %v242_v3 = vld [vmem:[#allocation5 + $0x68] sm:$0xff]  ;;  %s439_s28 = sshll.u32 %s732_s19, 7 }
  0x49   : > { %658 = vsyncadd (%p897_p6), [#allocation6], 4294965248  ;;  %459 = vmatprep.subr.mxu0 %v683_v0  ;;  %491 = vmatprep.mubr.msk.f32.mxu0 %vm684_vm0, %v683_v0  ;;  %v241_v4 = vld [vmem:[#allocation5 + $0x60] sm:$0xff]  ;;  %v240_v5 = vld [vmem:[#allocation5 + $0x58] sm:$0xff]  ;;  %s227_s29 = scalar_lea.vmem [#allocation7], %s433_s30  ;;  %s344_s13 = scalar_lea.hbm %s882_s4, %s439_s28 }
  0x4a   : > { %460 = vmatpush3.msra.mxu0 %v244_v1  ;;  %v239_v6 = vld [vmem:[#allocation5 + $0x50] sm:$0xff]  ;;  %v238_v7 = vld [vmem:[#allocation5 + $0x48] sm:$0xff]  ;;  %v237_v8 = vld [vmem:[#allocation5 + $0x40] sm:$0xff]  ;;  %s346_s7 = sshll.u32 %s227_s29, 4  ;;  %s333_s11 = scalar_lea.sflag [#allocation4], %s818_s25  ;;  %s347_s7 = int_to_ptr.vmem [resolvable:$true] %s346_s7 }
  0x4b   : > { %461 = vmatprep.subr.mxu0 %v683_v0  ;;  %v236_v9 = vld [vmem:[#allocation5 + $0x38] sm:$0xff]  ;;  %v235_v10 = vld [vmem:[#allocation5 + $0x30] sm:$0xff]  ;;  %v234_v11 = vld [vmem:[#allocation5 + $0x28] sm:$0xff]  ;;  %s609_s14 = scalar_lea.vmem %s347_s7, 128  ;;  %p898_p3 = scmp.ne.s32.totalorder %s892_s10, 0 }
  0x4c   : > { %462 = vmatpush3.msra.mxu0 %v243_v2  ;;  %v233_v12 = vld [vmem:[#allocation5 + $0x20] sm:$0xff]  ;;  %v232_v13 = vld [vmem:[#allocation5 + $0x18] sm:$0xff]  ;;  %v231_v14 = vld [vmem:[#allocation5 + $0x10] sm:$0xff]  ;;  %p610_p8 = scmp.ne.s32.totalorder %s347_s7, %s609_s14  ;;  %s685_s20 = smov [#allocation7]  }
  0x4d   : > { %463 = vmatprep.subr.mxu0 %v683_v0  ;;  %v230_v15 = vld [vmem:[#allocation5 + $0x8] sm:$0xff]  ;;  %v229_v16 = vld [vmem:[#allocation5] sm:$0xff]  ;;  %v228_v17 = vld [vmem:[%s824_s6] sm:$0xff]  ;;  %s613_s19 = sshll.u32 %s685_s20, 4  ;;  %s614_s19 = int_to_ptr.vmem [resolvable:$false] %s613_s19 }
  0x4e   : > { %464 = vmatpush3.msra.mxu0 %v242_v3  ;;  %v436_v18 = vld [vmem:[%s880_s2] ss:$0 sm:$0xff]  ;;  %p611_p11 = pnand %p610_p8, %p898_p3  ;;  %s615_s30 = scalar_lea.vmem %s614_s19, 256 }
  0x4f   : > { %465 = vmatprep.subr.mxu0 %v683_v0  ;;  %v437_v20 = vld [vmem:[%s881_s3] ss:$0 sm:$0xff]  ;;  %p616_p10 = scmp.lt.s32.totalorder %s347_s7, %s614_s19  ;;  %p617_p2 = scmp.lt.s32.totalorder %s615_s30, %s609_s14 }
  0x50   : > { %466 = vmatpush3.msra.mxu0 %v241_v4  ;;  %p612_p7 = pneg %p611_p11 }
  0x51   : > { %467 = vmatprep.subr.mxu0 %v683_v0  ;;  %p618_p13 = por %p617_p2, %p616_p10 }
  0x52   : > { %468 = vmatpush3.msra.mxu0 %v240_v5 }
  0x53   : > { %469 = vmatprep.subr.mxu0 %v683_v0  ;;  %p619_p0 = pnand %p618_p13, %p612_p7 }
  0x54   : > { %470 = vmatpush3.msra.mxu0 %v239_v6 }
  0x55   : > { %471 = vmatprep.subr.mxu0 %v683_v0 }
  0x56   : > { %472 = vmatpush3.msra.mxu0 %v238_v7 }
  0x57   : > { %473 = vmatprep.subr.mxu0 %v683_v0 }
  0x58   : > { %474 = vmatpush3.msra.mxu0 %v237_v8 }
  0x59   : > { %475 = vmatprep.subr.mxu0 %v683_v0 }
  0x5a   : > { %476 = vmatpush3.msra.mxu0 %v236_v9 }
  0x5b   : > { %477 = vmatprep.subr.mxu0 %v683_v0 }
  0x5c   : > { %478 = vmatpush3.msra.mxu0 %v235_v10 }
  0x5d   : > { %479 = vmatprep.subr.mxu0 %v683_v0 }
  0x5e   : > { %480 = vmatpush3.msra.mxu0 %v234_v11 }
  0x5f   : > { %481 = vmatprep.subr.mxu0 %v683_v0 }
  0x60   : > { %482 = vmatpush3.msra.mxu0 %v233_v12 }
  0x61   : > { %483 = vmatprep.subr.mxu0 %v683_v0 }
  0x62   : > { %484 = vmatpush3.msra.mxu0 %v232_v13 }
  0x63   : > { %485 = vmatprep.subr.mxu0 %v683_v0 }
  0x64   : > { %486 = vmatpush3.msra.mxu0 %v231_v14 }
  0x65   : > { %487 = vmatprep.subr.mxu0 %v683_v0 }
  0x66   : > { %488 = vmatpush3.msra.mxu0 %v230_v15 }
  0x67   : > { %489 = vmatprep.subr.mxu0 %v683_v0 }
  0x68   : > { %490 = vmatpush3.msra.mxu0 %v229_v16 }
  0x69   : > { %492 = vmatmul.mubr.f32.vlgmr.msra.gmra.mxu0 %v228_v17 }
 0x129   : > { %v311_v19 = vpop.f32.mrf.mxu0 }
 0x12a   : > { %v322_v21 = vmul.f32 %v436_v18, %v311_v19 }
 0x12b   : > { %v493_v22 = vpop.f32.mrf.mxu0 }
 0x12c   : > { %v330_v23 = vadd.f32 %v437_v20, %v322_v21 }
 0x12e   : > { %331 = vst [vmem:[%s227_s29] sm:$0xff] %v330_v23 }
 0x12f   : > { %622 = shalt.err (!%p619_p0)
}
 0x130   : > { %s623_s5 = scalar_lea.hbm %s344_s13, 128  ;;  %s627_s21 = scalar_lea.hbm %s882_s4, 256 }
 0x131   : > { %p624_p5 = scmp.ne.s32.totalorder %s344_s13, %s623_s5  ;;  %p628_p1 = scmp.lt.s32.totalorder %s344_s13, %s882_s4 }
 0x132   : > { %p629_p4 = scmp.lt.s32.totalorder %s627_s21, %s623_s5 }
 0x133   : > { %p625_p9 = pnand %p624_p5, %p898_p3 }
 0x134   : > { %p630_p6 = por %p629_p4, %p628_p1 }
 0x135   : > { %p626_p12 = pneg %p625_p9 }
 0x137   : > { %p631_p8 = pnand %p630_p6, %p626_p12 }
 0x139   : > { %634 = shalt.err (!%p631_p8)
}
 0x13a   : > { %500 = dma.vmem_to_hbm [thread:$0]  (%p898_p3), %s347_s7, 128, %s344_s13, %s333_s11  }
 0x13b PF: > { %s358_s26 = sand.u32 1, %s665_s15   ;;  %p899_p11 = scmp.ne.s32.totalorder %s888_s22, 0 }
 0x13c   : > { %p900_p7 = scmp.ge.s32.totalorder %s677_s18, 2  ;;  %s359_s28 = scalar_lea.sflag [#allocation4], %s358_s26 }
 0x13e   : > { %p511_p10 = pnand %p900_p7, %p899_p11 }
 0x140   : > { %p512_p2 = pneg %p511_p10 }
 0x142   : > { %660 = dma.done.wait (%p512_p2), %s359_s28, 128  }
 0x143   : > { %662 = vsyncadd (%p512_p2), %s359_s28, 4294967168  ;;  %p18_p13 = scmp.ge.s32.totalorder %s765_s27, 4   ;;  %s901_s15 = smov %s669_s16 }
 0x144   : > { %s902_s16 = smov %s673_s17  ;;  %s903_s17 = smov %s782_s9 }
 0x145   : > { %s904_s18 = smov %s765_s27  ;;  %20 = sbr.rel (!%p18_p13) target bundleno = 6 (0x6), region = 85 }
 0x14a   :  { %364 = vsyncpa [#allocation3], 1 }
 0x14b   :  { %366 = vsyncpa [#allocation3 + $0x1], 1 }
 0x14c   :  { %367 = vsyncpa [#allocation6], 1 }
 0x14d   :  { %368 = vsyncpa [#allocation4], 1 }
 0x14e   :  { %370 = vsyncpa [#allocation4 + $0x1], 1 }

</bundles_post_ra>
